<compile_context>
chip_gen: v6e
topology: v6e:2x2x1
jax: 0.10.0
libtpu: 0.0.40
codegen_flags: <defaults>
</compile_context>

<pallas_src>
import jax
import jax.numpy as jnp
from jax.experimental import pallas as pl
from jax.experimental.pallas import tpu as pltpu


def _round_up(n, m):
    return (n + m - 1) // m * m


def _critic_kernel_lane_dense(x_ref, w1_ref, b1_ref, w2_ref, b2_ref,
                              w3r_ref, b3_ref, out_ref):
    """out_dim == 1 path: lane-dense (1, tb) output block, layer-3 on VPU+XLU."""
    x = x_ref[...]                                   # (tb, in_dim) batch tile

    # layer1: Linear(in_dim, 64) + ReLU   (MXU matmul, f32 accumulate)
    h1 = jnp.dot(x, w1_ref[...], preferred_element_type=jnp.float32) + b1_ref[...]
    h1 = jnp.maximum(h1, 0.0)

    # layer2: Linear(64, 32) + ReLU
    h2 = jnp.dot(h1, w2_ref[...], preferred_element_type=jnp.float32) + b2_ref[...]
    h2 = jnp.maximum(h2, 0.0)

    # layer3: Linear(32, 1).  A (tb,32)@(32,1) MXU matmul would emit 1-lane
    # result vregs; do it as VPU multiply + XLU lane-reduce instead, then store
    # the tile as a lane-dense (1, tb) row.
    v = jnp.sum(h2 * w3r_ref[...], axis=-1)          # (tb,)
    tb = x.shape[0]
    out_ref[...] = (v.reshape(1, tb) + b3_ref[...]).astype(out_ref.dtype)


def _critic_kernel_generic(x_ref, w1_ref, b1_ref, w2_ref, b2_ref,
                           w3_ref, b3_ref, out_ref):
    """General out_dim path: plain (tb, out_dim) output block."""
    x = x_ref[...]
    h1 = jnp.maximum(
        jnp.dot(x, w1_ref[...], preferred_element_type=jnp.float32) + b1_ref[...], 0.0)
    h2 = jnp.maximum(
        jnp.dot(h1, w2_ref[...], preferred_element_type=jnp.float32) + b2_ref[...], 0.0)
    out = jnp.dot(h2, w3_ref[...], preferred_element_type=jnp.float32) + b3_ref[...]
    out_ref[...] = out.astype(out_ref.dtype)


def critic_forward(state, params, *, block_b=8192, vmem_limit_bytes=40 * 1024 * 1024):
    """state: (B, in_dim) f32; params: dict of w1,b1,w2,b2,w3,b3 (weights (in,out))."""
    w1, b1, w2, b2, w3, b3 = (params[k] for k in ("w1", "b1", "w2", "b2", "w3", "b3"))
    B, in_dim = state.shape
    out_dim = w3.shape[1]

    # Batch tile: multiple of 8 (sublane).  Cap at ceil(B/2) so the grid has at
    # least 2 steps whenever possible (keeps both v7x TensorCores busy); cap at
    # block_b for VMEM.  Pad B so every grid step sees a full (tb, in_dim) block.
    tb = min(block_b, _round_up(pl.cdiv(B, 2), 8))
    b_pad = _round_up(B, tb)
    if b_pad != B:
        state = jnp.pad(state, ((0, b_pad - B), (0, 0)))
    grid_b = b_pad // tb

    batch_spec = pl.BlockSpec((tb, in_dim), lambda i: (i, 0))        # streamed over batch
    const_spec = lambda a: pl.BlockSpec(a.shape, lambda i: (0, 0))   # VMEM-resident weights
    cparams = pltpu.CompilerParams(
        dimension_semantics=("parallel",),
        vmem_limit_bytes=vmem_limit_bytes,
    )

    if out_dim == 1:
        # Lane-dense output: (grid_b, tb) slab, one (1, tb) row per grid step.
        w3_row = w3.reshape(1, w3.shape[0])    # (1, 32); tiny one-time relayout
        b3_s = b3.reshape(1, 1)
        out = pl.pallas_call(
            _critic_kernel_lane_dense,
            out_shape=jax.ShapeDtypeStruct((grid_b, tb), jnp.float32),
            grid=(grid_b,),
            in_specs=[
                batch_spec,
                const_spec(w1), const_spec(b1),
                const_spec(w2), const_spec(b2),
                const_spec(w3_row), const_spec(b3_s),
            ],
            out_specs=pl.BlockSpec((1, tb), lambda i: (i, 0)),
            compiler_params=cparams,
        )(state, w1, b1, w2, b2, w3_row, b3_s)
        # (grid_b, tb) -> row-major flatten keeps batch order; drop padded rows.
        return out.reshape(-1)[:B][:, None]

    out = pl.pallas_call(
        _critic_kernel_generic,
        out_shape=jax.ShapeDtypeStruct((b_pad, out_dim), jnp.float32),
        grid=(grid_b,),
        in_specs=[
            batch_spec,
            const_spec(w1), const_spec(b1),
            const_spec(w2), const_spec(b2),
            const_spec(w3), const_spec(b3),
        ],
        out_specs=pl.BlockSpec((tb, out_dim), lambda i: (i, 0)),
        compiler_params=cparams,
    )(state, w1, b1, w2, b2, w3, b3)
    return out[:B]


def init_params(key, in_dim, out_dim):
    """Deterministic init matching nn.Linear shapes (weights stored as (in, out))."""
    def linear(k, fan_in, fan_out):
        kw, kb = jax.random.split(k)
        bound = 1.0 / jnp.sqrt(fan_in)
        w = jax.random.uniform(kw, (fan_in, fan_out), jnp.float32, -bound, bound)
        b = jax.random.uniform(kb, (1, fan_out), jnp.float32, -bound, bound)
        return w, b

    k1, k2, k3 = jax.random.split(key, 3)
    w1, b1 = linear(k1, in_dim, 64)
    w2, b2 = linear(k2, 64, 32)
    w3, b3 = linear(k3, 32, out_dim)
    return {"w1": w1, "b1": b1, "w2": w2, "b2": b2, "w3": w3, "b3": b3}


def critic_ref(state, p):
    """Pure-JAX reference (highest-precision matmuls) for correctness check."""
    hp = jax.lax.Precision.HIGHEST
    h1 = jnp.maximum(jnp.dot(state, p["w1"], precision=hp) + p["b1"], 0.0)
    h2 = jnp.maximum(jnp.dot(h1, p["w2"], precision=hp) + p["b2"], 0.0)
    return jnp.dot(h2, p["w3"], precision=hp) + p["b3"]


if __name__ == "__main__":
    key = jax.random.PRNGKey(0)
    k_params, k_a, k_b, k_c, k_p2 = jax.random.split(key, 5)

    in_dim, out_dim = 16, 1
    params = init_params(k_params, in_dim, out_dim)

    # Small case (single grid step, lane-dense out_dim==1 path).
    B0 = 8
    state0 = jax.random.normal(k_a, (B0, in_dim), jnp.float32)
    out0 = jax.block_until_ready(critic_forward(state0, params))
    ref0 = critic_ref(state0, params)
    assert out0.shape == (B0, out_dim), out0.shape
    assert jnp.allclose(out0, ref0, atol=1e-4, rtol=1e-4)

    # Multi-tile case (batch tiling, padding, >=2 parallel grid steps).
    B1 = 200
    state1 = jax.random.normal(k_b, (B1, in_dim), jnp.float32)
    out1 = jax.block_until_ready(critic_forward(state1, params, block_b=64))
    ref1 = critic_ref(state1, params)
    assert out1.shape == (B1, out_dim), out1.shape
    assert jnp.allclose(out1, ref1, atol=1e-4, rtol=1e-4)

    # Generic path (out_dim > 1) sanity check.
    params4 = init_params(k_p2, in_dim, 4)
    B2 = 32
    state2 = jax.random.normal(k_c, (B2, in_dim), jnp.float32)
    out2 = jax.block_until_ready(critic_forward(state2, params4, block_b=16))
    ref2 = critic_ref(state2, params4)
    assert out2.shape == (B2, 4), out2.shape
    assert jnp.allclose(out2, ref2, atol=1e-4, rtol=1e-4)

    print("KERNEL_OK")
</pallas_src>

<mosaic_0001>
module attributes {stable_mosaic.version = 11 : i64} {
  func.func @_critic_kernel_lane_dense(%arg0: i32, %arg1: memref<8x16xf32, #tpu.memory_space<vmem>>, %arg2: memref<16x64xf32, #tpu.memory_space<vmem>>, %arg3: memref<1x64xf32, #tpu.memory_space<vmem>>, %arg4: memref<64x32xf32, #tpu.memory_space<vmem>>, %arg5: memref<1x32xf32, #tpu.memory_space<vmem>>, %arg6: memref<1x32xf32, #tpu.memory_space<vmem>>, %arg7: memref<1x1xf32, #tpu.memory_space<vmem>>, %arg8: memref<1x8xf32, #tpu.memory_space<vmem>>) attributes {dimension_semantics = [#tpu.dimension_semantics<parallel>], iteration_bounds = array<i64: 1>, scalar_prefetch = 0 : i64, scratch_operands = 0 : i64, tpu.core_type = #tpu.core_type<tc>, window_params = [{transform_indices = @transform_0, window_bounds = array<i64: 8, 16>}, {pipeline_mode = #tpu.pipeline_mode<synchronous>, transform_indices = @transform_1, window_bounds = array<i64: 16, 64>}, {pipeline_mode = #tpu.pipeline_mode<synchronous>, transform_indices = @transform_2, window_bounds = array<i64: 1, 64>}, {pipeline_mode = #tpu.pipeline_mode<synchronous>, transform_indices = @transform_3, window_bounds = array<i64: 64, 32>}, {pipeline_mode = #tpu.pipeline_mode<synchronous>, transform_indices = @transform_4, window_bounds = array<i64: 1, 32>}, {pipeline_mode = #tpu.pipeline_mode<synchronous>, transform_indices = @transform_5, window_bounds = array<i64: 1, 32>}, {pipeline_mode = #tpu.pipeline_mode<synchronous>, transform_indices = @transform_6, window_bounds = array<i64: 1, 1>}, {transform_indices = @transform_7, window_bounds = array<i64: 1, 8>}]} {
    %c0 = arith.constant 0 : index
    %c0_0 = arith.constant 0 : index
    %0 = vector.load %arg1[%c0, %c0_0] : memref<8x16xf32, #tpu.memory_space<vmem>>, vector<8x16xf32>
    %c0_1 = arith.constant 0 : index
    %c0_2 = arith.constant 0 : index
    %1 = vector.load %arg2[%c0_1, %c0_2] : memref<16x64xf32, #tpu.memory_space<vmem>>, vector<16x64xf32>
    %cst = arith.constant dense<0.000000e+00> : vector<8x64xf32>
    %2 = tpu.matmul %0, %1, %cst {dimension_numbers = #tpu.dot_dimension_numbers<[1], [0], [0], [1], [0, 0, 1, 1], [], []>} : vector<8x16xf32>, vector<16x64xf32>, vector<8x64xf32> -> vector<8x64xf32>
    %c0_3 = arith.constant 0 : index
    %c0_4 = arith.constant 0 : index
    %3 = vector.load %arg3[%c0_3, %c0_4] : memref<1x64xf32, #tpu.memory_space<vmem>>, vector<1x64xf32>
    %4 = vector.broadcast %3 : vector<1x64xf32> to vector<8x64xf32>
    %5 = arith.addf %2, %4 : vector<8x64xf32>
    %cst_5 = arith.constant 0.000000e+00 : f32
    %6 = vector.broadcast %cst_5 : f32 to vector<8x64xf32>
    %7 = arith.maximumf %5, %6 : vector<8x64xf32>
    %c0_6 = arith.constant 0 : index
    %c0_7 = arith.constant 0 : index
    %8 = vector.load %arg4[%c0_6, %c0_7] : memref<64x32xf32, #tpu.memory_space<vmem>>, vector<64x32xf32>
    %cst_8 = arith.constant dense<0.000000e+00> : vector<8x32xf32>
    %9 = tpu.matmul %7, %8, %cst_8 {dimension_numbers = #tpu.dot_dimension_numbers<[1], [0], [0], [1], [0, 0, 1, 1], [], []>} : vector<8x64xf32>, vector<64x32xf32>, vector<8x32xf32> -> vector<8x32xf32>
    %c0_9 = arith.constant 0 : index
    %c0_10 = arith.constant 0 : index
    %10 = vector.load %arg5[%c0_9, %c0_10] : memref<1x32xf32, #tpu.memory_space<vmem>>, vector<1x32xf32>
    %11 = vector.broadcast %10 : vector<1x32xf32> to vector<8x32xf32>
    %12 = arith.addf %9, %11 : vector<8x32xf32>
    %cst_11 = arith.constant 0.000000e+00 : f32
    %13 = vector.broadcast %cst_11 : f32 to vector<8x32xf32>
    %14 = arith.maximumf %12, %13 : vector<8x32xf32>
    %c0_12 = arith.constant 0 : index
    %c0_13 = arith.constant 0 : index
    %15 = vector.load %arg6[%c0_12, %c0_13] : memref<1x32xf32, #tpu.memory_space<vmem>>, vector<1x32xf32>
    %16 = vector.broadcast %15 : vector<1x32xf32> to vector<8x32xf32>
    %17 = arith.mulf %14, %16 : vector<8x32xf32>
    %cst_14 = arith.constant dense<0.000000e+00> : vector<8xf32>
    %18 = vector.multi_reduction <add>, %17, %cst_14 [1] : vector<8x32xf32> to vector<8xf32>
    %19 = vector.shape_cast %18 : vector<8xf32> to vector<1x8xf32>
    %c0_15 = arith.constant 0 : index
    %c0_16 = arith.constant 0 : index
    %20 = vector.load %arg7[%c0_15, %c0_16] : memref<1x1xf32, #tpu.memory_space<vmem>>, vector<1x1xf32>
    %21 = vector.broadcast %20 : vector<1x1xf32> to vector<1x8xf32>
    %22 = arith.addf %19, %21 : vector<1x8xf32>
    %c0_17 = arith.constant 0 : index
    %c0_18 = arith.constant 0 : index
    %23 = vector.load %arg8[%c0_17, %c0_18] : memref<1x8xf32, #tpu.memory_space<vmem>>, vector<1x8xf32>
    tpu.vector_store %arg8[%c0_17, %c0_18], %22 {strides = array<i32>} : memref<1x8xf32, #tpu.memory_space<vmem>>, vector<1x8xf32>,
    return
  }
  func.func @transform_0(%arg0: i32) -> (i32, i32) {
    %c0_i32 = arith.constant 0 : i32
    %c0_i32_0 = arith.constant 0 : i32
    return %arg0, %c0_i32 : i32, i32
  }
  func.func @transform_1(%arg0: i32) -> (i32, i32) {
    %c0_i32 = arith.constant 0 : i32
    %c0_i32_0 = arith.constant 0 : i32
    %c0_i32_1 = arith.constant 0 : i32
    return %c0_i32, %c0_i32_0 : i32, i32
  }
  func.func @transform_2(%arg0: i32) -> (i32, i32) {
    %c0_i32 = arith.constant 0 : i32
    %c0_i32_0 = arith.constant 0 : i32
    %c0_i32_1 = arith.constant 0 : i32
    return %c0_i32, %c0_i32_0 : i32, i32
  }
  func.func @transform_3(%arg0: i32) -> (i32, i32) {
    %c0_i32 = arith.constant 0 : i32
    %c0_i32_0 = arith.constant 0 : i32
    %c0_i32_1 = arith.constant 0 : i32
    return %c0_i32, %c0_i32_0 : i32, i32
  }
  func.func @transform_4(%arg0: i32) -> (i32, i32) {
    %c0_i32 = arith.constant 0 : i32
    %c0_i32_0 = arith.constant 0 : i32
    %c0_i32_1 = arith.constant 0 : i32
    return %c0_i32, %c0_i32_0 : i32, i32
  }
  func.func @transform_5(%arg0: i32) -> (i32, i32) {
    %c0_i32 = arith.constant 0 : i32
    %c0_i32_0 = arith.constant 0 : i32
    %c0_i32_1 = arith.constant 0 : i32
    return %c0_i32, %c0_i32_0 : i32, i32
  }
  func.func @transform_6(%arg0: i32) -> (i32, i32) {
    %c0_i32 = arith.constant 0 : i32
    %c0_i32_0 = arith.constant 0 : i32
    %c0_i32_1 = arith.constant 0 : i32
    return %c0_i32, %c0_i32_0 : i32, i32
  }
  func.func @transform_7(%arg0: i32) -> (i32, i32) {
    %c0_i32 = arith.constant 0 : i32
    %c0_i32_0 = arith.constant 0 : i32
    return %arg0, %c0_i32 : i32, i32
  }
}

</mosaic_0001>

<bundles_post_ra>
// kernel: tpu_custom_call.1
= control target key start
LH: loop header
LB: loop body
LE: loop exit
PB: predicated region body
PF: predicated region fallthrough
CT: control target
= control target key end

     0   :  { %s415_s0 = inlined_call_operand.vmem [shape: f32[8,16], index: 0, kind: input, shape index: {}]   ;;  %s416_s1 = inlined_call_operand.vmem [shape: f32[16,64], index: 1, kind: input, shape index: {}]   ;;  %s417_s2 = inlined_call_operand.vmem [shape: f32[1,64], index: 2, kind: input, shape index: {}]   ;;  %s418_s3 = inlined_call_operand.vmem [shape: f32[64,32], index: 3, kind: input, shape index: {}]   ;;  %s419_s4 = inlined_call_operand.vmem [shape: f32[1,32], index: 4, kind: input, shape index: {}]   ;;  %s420_s5 = inlined_call_operand.vmem [shape: f32[1,32], index: 5, kind: input, shape index: {}]   ;;  %s421_s6 = inlined_call_operand.<no memory space> [shape: f32[1,1], index: 6, kind: input, shape index: {}]   ;;  %s422_s7 = inlined_call_operand.hbm [shape: f32[1,8], index: 7, kind: output, shape index: {}]  }
   0x1   :  { %v12_v0 = vstv %s421_s6 }
   0x2   :  { %13 = vst [vmem:[#allocation2] sm:$0x1] %v12_v0 }
   0x3   :  { %v31_v1 = vld [vmem:[%s416_s1 + $0x8] sm:$0xff]  ;;  %v321_v2 = vmov 0.0   ;;  %v30_v3 = vld [vmem:[%s416_s1] sm:$0xff]  ;;  %vm322_vm0 = vmmov 0   ;;  %v121_v4 = vld [vmem:[%s418_s3 + $0x38] sm:$0xff]  ;;  %vm39_vm1 = vcmask 130048  }
   0x4   :  { %268 = vmatprep.subr.mxu0 %v321_v2  ;;  %272 = vmatprep.mubr.msk.f32.mxu0 %vm322_vm0, %v321_v2  ;;  %v29_v5 = vld [vmem:[%s415_s0] sm:$0xff]  ;;  %v120_v6 = vld [vmem:[%s418_s3 + $0x30] sm:$0xff] }
   0x5   :  { %269 = vmatpush3.msra.mxu0 %v31_v1  ;;  %275 = vmatprep.subr.mxu1 %v321_v2 }
   0x6   :  { %270 = vmatprep.subr.mxu0 %v321_v2  ;;  %276 = vmatpush3.msra.mxu1 %v121_v4 }
   0x7   :  { %14 = vsyncpa [#allocation4], 0  ;;  %271 = vmatpush3.msra.mxu0 %v30_v3  ;;  %277 = vmatprep.subr.mxu1 %v321_v2  ;;  %v119_v7 = vld [vmem:[%s418_s3 + $0x28] sm:$0xff]  ;;  %v118_v8 = vld [vmem:[%s418_s3 + $0x20] sm:$0xff]  ;;  %vm129_vm2 = vcmask 523264   ;;  %v323_v18 = vmov 0   ;;  %v222_v28 = vlaneseq }
   0x8   :  { %273 = vmatmul.mubr.msk.f32.vlgmr.msra.gmra.mxu0 %vm39_vm1, %v29_v5  ;;  %278 = vmatpush3.msra.mxu1 %v120_v6  ;;  %v117_v9 = vld [vmem:[%s418_s3 + $0x18] sm:$0xff]  ;;  %v116_v10 = vld [vmem:[%s418_s3 + $0x10] sm:$0xff]  ;;  %v115_v11 = vld [vmem:[%s418_s3 + $0x8] sm:$0xff]  ;;  %vm212_vm3 = vcmask 261120   ;;  %vm235_vm4 = vcmask 57344  }
   0x9   :  { %279 = vmatprep.subr.mxu1 %v321_v2  ;;  %291 = vmatprep.mubr.msk.f32.mxu1 %vm322_vm0, %v321_v2  ;;  %v114_v12 = vld [vmem:[%s418_s3] sm:$0xff]  ;;  %v223_v29 = vshrl.u32 %v222_v28, 7  ;;  %v229_v32 = vand.u32 127, %v222_v28 }
   0xa   :  { %280 = vmatpush3.msra.mxu1 %v119_v7  ;;  %v251_v13 = vld [vmem:[%s417_s2] ss:$0 sm:$0xff]  ;;  %298 = vset.pattern.permute.xlu0 %v323_v18  ;;  %s324_s2 = smov [#allocation3]  }
   0xb   :  { %281 = vmatprep.subr.mxu1 %v321_v2  ;;  %v253_v19 = vld [vmem:[%s419_s4] ss:$0 sm:$0xff]  ;;  %v224_v31 = vsub.s32 0, %v223_v29  ;;  %v232_v35 = vsub.s32 %v229_v32, %v223_v29  ;;  %s243_s4 = sshll.u32 %s324_s2, 4  ;;  %s244_s4 = int_to_ptr.vmem [resolvable:$true] %s243_s4 }
   0xc   :  { %282 = vmatpush3.msra.mxu1 %v118_v8  ;;  %v255_v23 = vld [vmem:[%s420_s5] ss:$0 sm:$0xff]  ;;  %s299_s5 = scalar_lea.vmem %s244_s4, 16  ;;  %s303_s27 = scalar_lea.vmem %s244_s4, 32 }
   0xd   :  { %283 = vmatprep.subr.mxu1 %v321_v2  ;;  %v216_v27 = vld [vmem:[#allocation2] sm:$0x1]  ;;  %p300_p0 = scmp.ne.s32.totalorder %s244_s4, %s299_s5  ;;  %p304_p1 = scmp.lt.s32.totalorder %s244_s4, %s244_s4 }
   0xe   :  { %284 = vmatpush3.msra.mxu1 %v117_v9  ;;  %p305_p2 = scmp.lt.s32.totalorder %s303_s27, %s299_s5 }
   0xf   :  { %285 = vmatprep.subr.mxu1 %v321_v2 }
  0x10   :  { %286 = vmatpush3.msra.mxu1 %v116_v10  ;;  %p306_p3 = por %p305_p2, %p304_p1 }
  0x11   :  { %287 = vmatprep.subr.mxu1 %v321_v2 }
  0x12   :  { %288 = vmatpush3.msra.mxu1 %v115_v11  ;;  %p307_p4 = pnand %p306_p3, %p300_p0 }
  0x13   :  { %289 = vmatprep.subr.mxu1 %v321_v2 }
  0x14   :  { %290 = vmatpush3.msra.mxu1 %v114_v12 }
  0xc8   :  { %v109_v14 = vpop.f32.mrf.mxu0 }
  0xc9   :  { %v110_v15 = vadd.f32 %v251_v13, %v109_v14 }
  0xca   :  { %v274_v16 = vpop.f32.mrf.mxu0 }
  0xcb   :  { %v113_v17 = vmax.f32 %v110_v15, 0.0 }
  0xcd   :  { %292 = vmatmul.mubr.msk.f32.vlgmr.msra.gmra.mxu1 %vm129_vm2, %v113_v17 }
 0x18d   :  { %v199_v20 = vpop.f32.mrf.mxu1 }
 0x18e   :  { %v200_v21 = vadd.f32 %v253_v19, %v199_v20 }
 0x18f   :  { %v293_v22 = vpop.f32.mrf.mxu1 }
 0x190   :  { %v203_v24 = vmax.f32 %v200_v21, 0.0 }
 0x192   :  { %v211_v25 = vmul.f32 %v255_v23, %v203_v24 }
 0x194   :  { %v213_v26 = vsel %vm212_vm3, %v211_v25, 0.0 }
 0x195   :  { %214 = vadd.xlane.f32.xlu0 %v213_v26 }
 0x1ab   :  { %219 = vperm.xlu0 %298, %v216_v27  }
 0x21e   :  { %v215_v30 = vpop.xlane.xlu0 %214 }
 0x226   :  { %v220_v33 = vpop.permute.xlu0 %219 }
 0x227   :  { %v225_v34 = vrot.slane %v220_v33, %v224_v31 }
 0x229   :  { %v226_v36 = vadd.f32 %v225_v34, %v215_v30 }
 0x22b   :  { %v233_v37 = vrot.slane %v226_v36, %v232_v35 }
 0x22d   :  { %236 = vst.msk [vmem:[#allocation3] sm:$0x1] %vm235_vm4, %v233_v37 }
 0x22e   :  { %310 = shalt.err (!%p307_p4)
}
 0x22f   :  { %246 = dma.vmem_to_hbm [thread:$0]  %s244_s4, 16, %s422_s7, [#allocation4]  }
 0x230   :  { %319 = dma.done.wait [#allocation4], 16  }
 0x231   :  { %320 = vsyncadd [#allocation4], 4294967280 }
 0x232   :  { %250 = vsyncpa [#allocation4], 1 }

</bundles_post_ra>
